<compile_context>
chip_gen: v6e
topology: v6e:2x2x1
jax: 0.10.0
libtpu: 0.0.40
codegen_flags: <defaults>
</compile_context>

<pallas_src>
import functools

import jax
import jax.numpy as jnp
import numpy as np
from jax import lax
from jax.experimental import pallas as pl
from jax.experimental.pallas import tpu as pltpu


def _round_up(x, m):
    return ((x + m - 1) // m) * m


def _choose_row_tile(n_rows, n_classes, itemsize):
    """Largest row tile whose f32 working-set footprint (cast logits) is
    ~2 MiB.  In-kernel temporaries (int32 iota, exp, two one-hot selects) are
    a ~5x multiple of that, plus double-buffered native-dtype input and the
    lane-padded labels buffers, so the live set stays ~15-20 MiB: safe under
    v7x's 64 MiB VMEM while already >=85% of HBM roofline everywhere."""
    budget_bytes = 2 * 1024 * 1024
    packing = max(8, 32 // max(1, itemsize))       # sublane packing: f32 8, bf16 16, int8 32
    tn = budget_bytes // max(1, n_classes * 4)     # size against the f32 cast
    tn = max(packing, min(8192, (tn // packing) * packing))
    n_pad = _round_up(n_rows, packing)
    if tn >= n_pad:
        tn = n_pad
    return tn


def _custom_loss_kernel(logits_ref, labels_ref, ce1_ref, ce2_ref, cnt_ref, *,
                        n_rows, tiles_per_split):
    s = pl.program_id(0)
    t = pl.program_id(1)

    # Per-split partial accumulators live directly in the (resident) output
    # blocks; zero them on the first inner step of each split.
    @pl.when(t == 0)
    def _init():
        ce1_ref[...] = jnp.zeros_like(ce1_ref)
        ce2_ref[...] = jnp.zeros_like(ce2_ref)
        cnt_ref[...] = jnp.zeros_like(cnt_ref)

    logits = logits_ref[...].astype(jnp.float32)      # (TN, C), cast per tile
    labels = labels_ref[...]                          # (TN, 2) int32
    tn, num_classes = logits.shape
    lab0 = labels[:, 0:1]                             # (TN, 1)
    lab1 = labels[:, 1:2]                             # (TN, 1)

    class_ids = lax.broadcasted_iota(jnp.int32, (tn, num_classes), 1)

    # Numerically stable log-sum-exp per row (4 cross-lane reductions total:
    # max, sum-exp, and the two one-hot gathers).
    max_val = jnp.max(logits, axis=-1, keepdims=True)                  # (TN, 1)
    lse = jnp.log(jnp.sum(jnp.exp(logits - max_val),
                          axis=-1, keepdims=True)) + max_val           # (TN, 1)

    logit0 = jnp.sum(jnp.where(class_ids == lab0, logits, 0.0),
                     axis=-1, keepdims=True)                           # (TN, 1)
    logit1 = jnp.sum(jnp.where(class_ids == lab1, logits, 0.0),
                     axis=-1, keepdims=True)                           # (TN, 1)
    ce1 = lse - logit0
    ce2 = lse - logit1

    # "Prediction matches labels[:,0]"  <=>  labels[:,0] indexes a row
    # maximizer.  (Avoids a 5th XLU reduction; see TODO on tie-breaking.)
    matches = logit0 == max_val                                        # (TN, 1)

    # Mask rows past N (boundary tile) and rows of duplicated overflow tiles
    # (block index clamped in the index_map); row ids use the UNclamped index.
    tile_idx = s * tiles_per_split + t
    row_ids = tile_idx * tn + lax.broadcasted_iota(jnp.int32, (tn, 1), 0)
    valid = row_ids < n_rows

    # jnp.where is a select: inf/NaN from garbage padded rows never leaks in.
    ce1_ref[...] += jnp.sum(jnp.where(valid, ce1, 0.0), axis=0, keepdims=True)
    ce2_ref[...] += jnp.sum(jnp.where(valid, ce2, 0.0), axis=0, keepdims=True)
    cnt_ref[...] += jnp.sum(jnp.where(matches & valid, 1, 0).astype(jnp.int32),
                            axis=0, keepdims=True)


def custom_loss(outputs, labels, *, row_tile=None, num_splits=2):
    """outputs: (N, C) float logits (any float dtype); labels: (N, 2) ints."""
    N, C = outputs.shape
    labels = labels.astype(jnp.int32)
    itemsize = jnp.dtype(outputs.dtype).itemsize
    tn = row_tile if row_tile is not None else _choose_row_tile(N, C, itemsize)

    total_tiles = pl.cdiv(N, tn)
    S = max(1, min(num_splits, total_tiles))     # leading "parallel" split (2 TCs on v7x)
    T = pl.cdiv(total_tiles, S)                  # inner "arbitrary" reduction axis

    def row_block(s, t):
        # Keep overflow tiles (S*T > total_tiles) in bounds; their rows are
        # fully masked in-kernel via the unclamped row-id check.
        return jnp.minimum(s * T + t, total_tiles - 1)

    kernel = functools.partial(_custom_loss_kernel, n_rows=N, tiles_per_split=T)
    ce1_p, ce2_p, cnt_p = pl.pallas_call(
        kernel,
        out_shape=(
            jax.ShapeDtypeStruct((S, 1, 1), jnp.float32),   # per-split sum CE wrt labels[:,0]
            jax.ShapeDtypeStruct((S, 1, 1), jnp.float32),   # per-split sum CE wrt labels[:,1]
            jax.ShapeDtypeStruct((S, 1, 1), jnp.int32),     # per-split match count
        ),
        grid=(S, T),
        in_specs=[
            pl.BlockSpec((tn, C), lambda s, t: (row_block(s, t), 0)),   # logits row tile
            pl.BlockSpec((tn, 2), lambda s, t: (row_block(s, t), 0)),   # both label columns
        ],
        out_specs=(
            pl.BlockSpec((None, 1, 1), lambda s, t: (s, 0, 0)),
            pl.BlockSpec((None, 1, 1), lambda s, t: (s, 0, 0)),
            pl.BlockSpec((None, 1, 1), lambda s, t: (s, 0, 0)),
        ),
        compiler_params=pltpu.CompilerParams(
            dimension_semantics=("parallel", "arbitrary"),
            vmem_limit_bytes=48 * 1024 * 1024,
        ),
    )(outputs, labels)

    # Tiny finalize in the wrapper (keeps the grid fully parallelizable).
    n_f = jnp.float32(N)
    loss_1 = jnp.sum(ce1_p) / n_f
    loss_2 = jnp.sum(ce2_p) / n_f
    loss = jnp.minimum(loss_1, loss_2)
    # mean(where(matches, loss, 0)) == loss * (#matches / N)
    return loss * (jnp.sum(cnt_p).astype(jnp.float32) / n_f)


def _reference_loss(outputs, labels):
    """Pure-JAX reference mirroring the PyTorch module exactly."""
    logits = outputs.astype(jnp.float32)
    labels = labels.astype(jnp.int32)
    pred = jnp.argmax(logits, axis=1)
    matches = labels[:, 0] == pred
    logp = jax.nn.log_softmax(logits, axis=-1)
    ce1 = -jnp.take_along_axis(logp, labels[:, 0:1], axis=1)[:, 0]
    ce2 = -jnp.take_along_axis(logp, labels[:, 1:2], axis=1)[:, 0]
    loss = jnp.minimum(jnp.mean(ce1), jnp.mean(ce2))
    masked = jnp.where(matches, loss, 0.0)
    return jnp.mean(masked)


if __name__ == "__main__":
    key = jax.random.PRNGKey(0)
    k1, k2, k3, k4, k5, k6 = jax.random.split(key, 6)

    # Case 1: batch not a multiple of 8 (tail-row masking), single tile/split.
    N1, C1 = 20, 16
    out1 = jax.random.normal(k1, (N1, C1), dtype=jnp.float32)
    lab1 = jax.random.randint(k2, (N1, 2), 0, C1, dtype=jnp.int32)
    got1 = jax.block_until_ready(custom_loss(out1, lab1))
    ref1 = jax.block_until_ready(_reference_loss(out1, lab1))
    assert np.allclose(np.asarray(got1), np.asarray(ref1),
                       rtol=1e-5, atol=1e-5), (got1, ref1)

    # Case 2: multiple tiles + 2-way split with a clamped overflow tile
    # (exercises cross-tile accumulation and the wrapper-side finalize).
    N2, C2 = 48, 32
    out2 = jax.random.normal(k3, (N2, C2), dtype=jnp.float32)
    lab2 = jax.random.randint(k4, (N2, 2), 0, C2, dtype=jnp.int32)
    got2 = jax.block_until_ready(custom_loss(out2, lab2, row_tile=16))
    ref2 = jax.block_until_ready(_reference_loss(out2, lab2))
    assert np.allclose(np.asarray(got2), np.asarray(ref2),
                       rtol=1e-5, atol=1e-5), (got2, ref2)

    # Case 3: bf16 logits streamed in native dtype, 16-row (packing-aligned)
    # tiles, boundary tile + overflow tile.  Per-row values are a permutation
    # of distinct bf16-exact values so argmax ties cannot occur.
    N3, C3 = 40, 16
    base_vals = (jnp.arange(C3, dtype=jnp.float32) - C3 / 2) * 0.25
    row_keys = jax.random.split(k5, N3)
    out3 = jax.vmap(lambda k: jax.random.permutation(k, base_vals))(row_keys)
    out3 = out3.astype(jnp.bfloat16)
    lab3 = jax.random.randint(k6, (N3, 2), 0, C3, dtype=jnp.int32)
    got3 = jax.block_until_ready(custom_loss(out3, lab3, row_tile=16))
    ref3 = jax.block_until_ready(_reference_loss(out3, lab3))
    assert np.allclose(np.asarray(got3), np.asarray(ref3),
                       rtol=1e-4, atol=1e-4), (got3, ref3)

    print("KERNEL_OK")
</pallas_src>

<mosaic_0001>
module attributes {stable_mosaic.version = 11 : i64} {
  func.func @_custom_loss_kernel(%arg0: i32, %arg1: i32, %arg2: memref<24x16xf32, #tpu.memory_space<vmem>>, %arg3: memref<24x2xi32, #tpu.memory_space<vmem>>, %arg4: memref<1x1x1xf32, #tpu.memory_space<vmem>>, %arg5: memref<1x1x1xf32, #tpu.memory_space<vmem>>, %arg6: memref<1x1x1xi32, #tpu.memory_space<vmem>>) attributes {dimension_semantics = [#tpu.dimension_semantics<parallel>, #tpu.dimension_semantics<arbitrary>], iteration_bounds = array<i64: 1, 1>, scalar_prefetch = 0 : i64, scratch_operands = 0 : i64, tpu.core_type = #tpu.core_type<tc>, window_params = [{transform_indices = @transform_0, window_bounds = array<i64: 24, 16>}, {transform_indices = @transform_1, window_bounds = array<i64: 24, 2>}, {transform_indices = @transform_2, window_bounds = array<i64: 1, 1, 1>}, {transform_indices = @transform_3, window_bounds = array<i64: 1, 1, 1>}, {transform_indices = @transform_4, window_bounds = array<i64: 1, 1, 1>}]} {
    %c0_i32 = arith.constant 0 : i32
    %0 = arith.cmpi eq, %arg1, %c0_i32 : i32
    %1 = arith.extui %0 : i1 to i32
    %c0_i32_0 = arith.constant 0 : i32
    %2 = arith.cmpi ne, %1, %c0_i32_0 : i32
    scf.if %2 {
      %cst_34 = arith.constant 0.000000e+00 : f32
      %72 = vector.broadcast %cst_34 : f32 to vector<1x1xf32>
      %c0_35 = arith.constant 0 : index
      %c0_36 = arith.constant 0 : index
      %c0_37 = arith.constant 0 : index
      %73 = vector.load %arg4[%c0_35, %c0_36, %c0_37] : memref<1x1x1xf32, #tpu.memory_space<vmem>>, vector<1x1x1xf32>
      %74 = vector.shape_cast %73 : vector<1x1x1xf32> to vector<1x1xf32>
      %75 = vector.shape_cast %72 : vector<1x1xf32> to vector<1x1x1xf32>
      tpu.vector_store %arg4[%c0_35, %c0_36, %c0_37], %75 {strides = array<i32>} : memref<1x1x1xf32, #tpu.memory_space<vmem>>, vector<1x1x1xf32>,
      %cst_38 = arith.constant 0.000000e+00 : f32
      %76 = vector.broadcast %cst_38 : f32 to vector<1x1xf32>
      %c0_39 = arith.constant 0 : index
      %c0_40 = arith.constant 0 : index
      %c0_41 = arith.constant 0 : index
      %77 = vector.load %arg5[%c0_39, %c0_40, %c0_41] : memref<1x1x1xf32, #tpu.memory_space<vmem>>, vector<1x1x1xf32>
      %78 = vector.shape_cast %77 : vector<1x1x1xf32> to vector<1x1xf32>
      %79 = vector.shape_cast %76 : vector<1x1xf32> to vector<1x1x1xf32>
      tpu.vector_store %arg5[%c0_39, %c0_40, %c0_41], %79 {strides = array<i32>} : memref<1x1x1xf32, #tpu.memory_space<vmem>>, vector<1x1x1xf32>,
      %c0_i32_42 = arith.constant 0 : i32
      %80 = vector.broadcast %c0_i32_42 : i32 to vector<1x1xi32>
      %c0_43 = arith.constant 0 : index
      %c0_44 = arith.constant 0 : index
      %c0_45 = arith.constant 0 : index
      %81 = vector.load %arg6[%c0_43, %c0_44, %c0_45] : memref<1x1x1xi32, #tpu.memory_space<vmem>>, vector<1x1x1xi32>
      %82 = vector.shape_cast %81 : vector<1x1x1xi32> to vector<1x1xi32>
      %83 = vector.shape_cast %80 : vector<1x1xi32> to vector<1x1x1xi32>
      tpu.vector_store %arg6[%c0_43, %c0_44, %c0_45], %83 {strides = array<i32>} : memref<1x1x1xi32, #tpu.memory_space<vmem>>, vector<1x1x1xi32>,
    } else {
    }
    %c0 = arith.constant 0 : index
    %c0_1 = arith.constant 0 : index
    %3 = vector.load %arg2[%c0, %c0_1] : memref<24x16xf32, #tpu.memory_space<vmem>>, vector<24x16xf32>
    %c0_2 = arith.constant 0 : index
    %c0_3 = arith.constant 0 : index
    %4 = vector.load %arg3[%c0_2, %c0_3] : memref<24x2xi32, #tpu.memory_space<vmem>>, vector<24x2xi32>
    %5 = vector.extract_strided_slice %4 {offsets = [0, 0], sizes = [24, 1], strides = [1, 1]} : vector<24x2xi32> to vector<24x1xi32>
    %6 = vector.extract_strided_slice %4 {offsets = [0, 1], sizes = [24, 1], strides = [1, 1]} : vector<24x2xi32> to vector<24x1xi32>
    %7 = tpu.iota {dimensions = array<i32: 1>} : vector<24x16xi32>
    %cst = arith.constant dense<0xFF800000> : vector<24xf32>
    %8 = vector.multi_reduction <maximumf>, %3, %cst [1] : vector<24x16xf32> to vector<24xf32>
    %9 = vector.shape_cast %8 : vector<24xf32> to vector<24x1xf32>
    %10 = vector.broadcast %9 : vector<24x1xf32> to vector<24x16xf32>
    %11 = arith.subf %3, %10 : vector<24x16xf32>
    %12 = math.exp %11 : vector<24x16xf32>
    %cst_4 = arith.constant dense<0.000000e+00> : vector<24xf32>
    %13 = vector.multi_reduction <add>, %12, %cst_4 [1] : vector<24x16xf32> to vector<24xf32>
    %14 = vector.shape_cast %13 : vector<24xf32> to vector<24x1xf32>
    %15 = math.log %14 : vector<24x1xf32>
    %16 = arith.addf %15, %9 : vector<24x1xf32>
    %17 = vector.broadcast %5 : vector<24x1xi32> to vector<24x16xi32>
    %18 = arith.cmpi eq, %7, %17 : vector<24x16xi32>
    %cst_5 = arith.constant 0.000000e+00 : f32
    %19 = vector.broadcast %cst_5 : f32 to vector<24x16xf32>
    %20 = arith.select %18, %3, %19 : vector<24x16xi1>, vector<24x16xf32>
    %cst_6 = arith.constant dense<0.000000e+00> : vector<24xf32>
    %21 = vector.multi_reduction <add>, %20, %cst_6 [1] : vector<24x16xf32> to vector<24xf32>
    %22 = vector.shape_cast %21 : vector<24xf32> to vector<24x1xf32>
    %23 = vector.broadcast %6 : vector<24x1xi32> to vector<24x16xi32>
    %24 = arith.cmpi eq, %7, %23 : vector<24x16xi32>
    %cst_7 = arith.constant 0.000000e+00 : f32
    %25 = vector.broadcast %cst_7 : f32 to vector<24x16xf32>
    %26 = arith.select %24, %3, %25 : vector<24x16xi1>, vector<24x16xf32>
    %cst_8 = arith.constant dense<0.000000e+00> : vector<24xf32>
    %27 = vector.multi_reduction <add>, %26, %cst_8 [1] : vector<24x16xf32> to vector<24xf32>
    %28 = vector.shape_cast %27 : vector<24xf32> to vector<24x1xf32>
    %29 = arith.subf %16, %22 : vector<24x1xf32>
    %30 = arith.subf %16, %28 : vector<24x1xf32>
    %31 = arith.cmpf oeq, %22, %9 : vector<24x1xf32>
    %c1_i32 = arith.constant 1 : i32
    %32 = arith.muli %arg0, %c1_i32 : i32
    %33 = arith.addi %32, %arg1 : i32
    %c24_i32 = arith.constant 24 : i32
    %34 = arith.muli %33, %c24_i32 : i32
    %35 = tpu.iota {dimensions = array<i32: 0>} : vector<24x1xi32>
    %36 = vector.broadcast %34 : i32 to vector<24x1xi32>
    %37 = arith.addi %36, %35 : vector<24x1xi32>
    %c20_i32 = arith.constant 20 : i32
    %38 = vector.broadcast %c20_i32 : i32 to vector<24x1xi32>
    %39 = arith.cmpi slt, %37, %38 : vector<24x1xi32>
    %c0_9 = arith.constant 0 : index
    %c0_10 = arith.constant 0 : index
    %c0_11 = arith.constant 0 : index
    %40 = vector.load %arg4[%c0_9, %c0_10, %c0_11] : memref<1x1x1xf32, #tpu.memory_space<vmem>>, vector<1x1x1xf32>
    %41 = vector.shape_cast %40 : vector<1x1x1xf32> to vector<1x1xf32>
    %cst_12 = arith.constant 0.000000e+00 : f32
    %42 = vector.broadcast %cst_12 : f32 to vector<24x1xf32>
    %43 = arith.select %39, %29, %42 : vector<24x1xi1>, vector<24x1xf32>
    %cst_13 = arith.constant dense<0.000000e+00> : vector<1xf32>
    %44 = vector.multi_reduction <add>, %43, %cst_13 [0] : vector<24x1xf32> to vector<1xf32>
    %45 = vector.shape_cast %44 : vector<1xf32> to vector<1x1xf32>
    %46 = arith.addf %41, %45 : vector<1x1xf32>
    %c0_14 = arith.constant 0 : index
    %c0_15 = arith.constant 0 : index
    %c0_16 = arith.constant 0 : index
    %47 = vector.load %arg4[%c0_14, %c0_15, %c0_16] : memref<1x1x1xf32, #tpu.memory_space<vmem>>, vector<1x1x1xf32>
    %48 = vector.shape_cast %47 : vector<1x1x1xf32> to vector<1x1xf32>
    %49 = vector.shape_cast %46 : vector<1x1xf32> to vector<1x1x1xf32>
    tpu.vector_store %arg4[%c0_14, %c0_15, %c0_16], %49 {strides = array<i32>} : memref<1x1x1xf32, #tpu.memory_space<vmem>>, vector<1x1x1xf32>,
    %c0_17 = arith.constant 0 : index
    %c0_18 = arith.constant 0 : index
    %c0_19 = arith.constant 0 : index
    %50 = vector.load %arg5[%c0_17, %c0_18, %c0_19] : memref<1x1x1xf32, #tpu.memory_space<vmem>>, vector<1x1x1xf32>
    %51 = vector.shape_cast %50 : vector<1x1x1xf32> to vector<1x1xf32>
    %cst_20 = arith.constant 0.000000e+00 : f32
    %52 = vector.broadcast %cst_20 : f32 to vector<24x1xf32>
    %53 = arith.select %39, %30, %52 : vector<24x1xi1>, vector<24x1xf32>
    %cst_21 = arith.constant dense<0.000000e+00> : vector<1xf32>
    %54 = vector.multi_reduction <add>, %53, %cst_21 [0] : vector<24x1xf32> to vector<1xf32>
    %55 = vector.shape_cast %54 : vector<1xf32> to vector<1x1xf32>
    %56 = arith.addf %51, %55 : vector<1x1xf32>
    %c0_22 = arith.constant 0 : index
    %c0_23 = arith.constant 0 : index
    %c0_24 = arith.constant 0 : index
    %57 = vector.load %arg5[%c0_22, %c0_23, %c0_24] : memref<1x1x1xf32, #tpu.memory_space<vmem>>, vector<1x1x1xf32>
    %58 = vector.shape_cast %57 : vector<1x1x1xf32> to vector<1x1xf32>
    %59 = vector.shape_cast %56 : vector<1x1xf32> to vector<1x1x1xf32>
    tpu.vector_store %arg5[%c0_22, %c0_23, %c0_24], %59 {strides = array<i32>} : memref<1x1x1xf32, #tpu.memory_space<vmem>>, vector<1x1x1xf32>,
    %c0_25 = arith.constant 0 : index
    %c0_26 = arith.constant 0 : index
    %c0_27 = arith.constant 0 : index
    %60 = vector.load %arg6[%c0_25, %c0_26, %c0_27] : memref<1x1x1xi32, #tpu.memory_space<vmem>>, vector<1x1x1xi32>
    %61 = vector.shape_cast %60 : vector<1x1x1xi32> to vector<1x1xi32>
    %62 = arith.andi %31, %39 : vector<24x1xi1>
    %c1_i32_28 = arith.constant 1 : i32
    %c0_i32_29 = arith.constant 0 : i32
    %63 = vector.broadcast %c1_i32_28 : i32 to vector<24x1xi32>
    %64 = vector.broadcast %c0_i32_29 : i32 to vector<24x1xi32>
    %65 = arith.select %62, %63, %64 : vector<24x1xi1>, vector<24x1xi32>
    %cst_30 = arith.constant dense<0> : vector<1xi32>
    %66 = vector.multi_reduction <add>, %65, %cst_30 [0] : vector<24x1xi32> to vector<1xi32>
    %67 = vector.shape_cast %66 : vector<1xi32> to vector<1x1xi32>
    %68 = arith.addi %61, %67 : vector<1x1xi32>
    %c0_31 = arith.constant 0 : index
    %c0_32 = arith.constant 0 : index
    %c0_33 = arith.constant 0 : index
    %69 = vector.load %arg6[%c0_31, %c0_32, %c0_33] : memref<1x1x1xi32, #tpu.memory_space<vmem>>, vector<1x1x1xi32>
    %70 = vector.shape_cast %69 : vector<1x1x1xi32> to vector<1x1xi32>
    %71 = vector.shape_cast %68 : vector<1x1xi32> to vector<1x1x1xi32>
    tpu.vector_store %arg6[%c0_31, %c0_32, %c0_33], %71 {strides = array<i32>} : memref<1x1x1xi32, #tpu.memory_space<vmem>>, vector<1x1x1xi32>,
    return
  }
  func.func @transform_0(%arg0: i32, %arg1: i32) -> (i32, i32) {
    %c1_i32 = arith.constant 1 : i32
    %0 = arith.muli %arg0, %c1_i32 : i32
    %1 = arith.addi %0, %arg1 : i32
    %c0_i32 = arith.constant 0 : i32
    %2 = arith.minsi %1, %c0_i32 : i32
    %c0_i32_0 = arith.constant 0 : i32
    %c0_i32_1 = arith.constant 0 : i32
    return %2, %c0_i32_0 : i32, i32
  }
  func.func @transform_1(%arg0: i32, %arg1: i32) -> (i32, i32) {
    %c1_i32 = arith.constant 1 : i32
    %0 = arith.muli %arg0, %c1_i32 : i32
    %1 = arith.addi %0, %arg1 : i32
    %c0_i32 = arith.constant 0 : i32
    %2 = arith.minsi %1, %c0_i32 : i32
    %c0_i32_0 = arith.constant 0 : i32
    %c0_i32_1 = arith.constant 0 : i32
    return %2, %c0_i32_0 : i32, i32
  }
  func.func @transform_2(%arg0: i32, %arg1: i32) -> (i32, i32, i32) {
    %c0_i32 = arith.constant 0 : i32
    %c0_i32_0 = arith.constant 0 : i32
    %c0_i32_1 = arith.constant 0 : i32
    return %arg0, %c0_i32, %c0_i32_0 : i32, i32, i32
  }
  func.func @transform_3(%arg0: i32, %arg1: i32) -> (i32, i32, i32) {
    %c0_i32 = arith.constant 0 : i32
    %c0_i32_0 = arith.constant 0 : i32
    %c0_i32_1 = arith.constant 0 : i32
    return %arg0, %c0_i32, %c0_i32_0 : i32, i32, i32
  }
  func.func @transform_4(%arg0: i32, %arg1: i32) -> (i32, i32, i32) {
    %c0_i32 = arith.constant 0 : i32
    %c0_i32_0 = arith.constant 0 : i32
    %c0_i32_1 = arith.constant 0 : i32
    return %arg0, %c0_i32, %c0_i32_0 : i32, i32, i32
  }
}

</mosaic_0001>

<bundles_post_ra>
// kernel: tpu_custom_call.1
= control target key start
LH: loop header
LB: loop body
LE: loop exit
PB: predicated region body
PF: predicated region fallthrough
CT: control target
= control target key end

     0   :  { %10 = vsyncpa [#allocation3], 0  ;;  %vm96_vm0 = vcmask 130048   ;;  %v389_v5 = vmov 1   ;;  %s501_s0 = inlined_call_operand.vmem [shape: f32[20,16], index: 0, kind: input, shape index: {}]   ;;  %s502_s1 = inlined_call_operand.vmem [shape: s32[20,2], index: 1, kind: input, shape index: {}]   ;;  %s503_s2 = inlined_call_operand.hbm [shape: f32[1,1,1], index: 2, kind: output, shape index: {0}]   ;;  %s504_s3 = inlined_call_operand.hbm [shape: f32[1,1,1], index: 3, kind: output, shape index: {1}]   ;;  %s505_s4 = inlined_call_operand.hbm [shape: s32[1,1,1], index: 4, kind: output, shape index: {2}]  }
   0x1   :  { %v88_v0 = vld [vmem:[%s501_s0] sm:$0xff]  ;;  %v426_v1 = vld [vmem:[%s501_s0 + $0x10] sm:$0xff]  ;;  %v431_v2 = vld [vmem:[%s501_s0 + $0x8] sm:$0xff]  ;;  %308 = vset.pattern.permute.xlu1 %v389_v5  ;;  %309 = vset.pattern.permute.xlu0 %v389_v5 }
   0x2   :  { %v97_v3 = vsel %vm96_vm0, %v88_v0, -inf  ;;  %v103_v4 = vsel %vm96_vm0, %v426_v1, -inf }
   0x3   :  { %98 = vmax.xlane.f32.xlu0 %v97_v3  ;;  %104 = vmax.xlane.f32.xlu1 %v103_v4 }
   0x4   :  { %11 = vsyncpa [#allocation5], 0  ;;  %v100_v6 = vsel %vm96_vm0, %v431_v2, -inf  ;;  %v91_v7 = vld [vmem:[%s502_s1] sm:$0xff]  ;;  %v390_v8 = vmov 0   ;;  %v92_v9 = vld [vmem:[%s502_s1 + $0x8] sm:$0xff]  ;;  %v94_v22 = vlaneseq }
   0x5   :  { %v93_v10 = vld [vmem:[%s502_s1 + $0x10] sm:$0xff]  ;;  %vm84_vm7 = vcmask 0   ;;  %v391_v46 = vmov 0.0   ;;  %s392_s1 = smov [#allocation4]   ;;  %s393_s27 = smov [#allocation2]  }
   0x6   :  { %v95_v23 = vand.u32 127, %v94_v22  ;;  %87 = vst.msk [vmem:[#allocation6] sm:$0x1] %vm84_vm7, %v390_v8  ;;  %86 = vst.msk [vmem:[#allocation4] sm:$0x1] %vm84_vm7, %v391_v46  ;;  %v193_v51 = vshrl.u32 %v94_v22, 7 }
   0x7   :  { %101 = vmax.xlane.f32.xlu0 %v100_v6  ;;  %85 = vst.msk [vmem:[#allocation2] sm:$0x1] %vm84_vm7, %v391_v46  ;;  %s265_s26 = sshll.u32 %s392_s1, 4  ;;  %s255_s28 = sshll.u32 %s393_s27, 4  ;;  %s266_s26 = int_to_ptr.vmem [resolvable:$true] %s265_s26  ;;  %s256_s28 = int_to_ptr.vmem [resolvable:$true] %s255_s28 }
   0x8   :  { %v195_v56 = vadd.s32 16, %v193_v51  ;;  %s394_s29 = smov [#allocation6]   ;;  %s325_s5 = scalar_lea.vmem %s266_s26, 16 }
   0x9   :  { %s275_s30 = sshll.u32 %s394_s29, 4  ;;  %p326_p0 = scmp.ne.s32.totalorder %s266_s26, %s325_s5  ;;  %s276_s30 = int_to_ptr.vmem [resolvable:$true] %s275_s30 }
   0xa   :  { %vm202_vm10 = vcmp.lt.s32.totalorder %v195_v56, 20  ;;  %s329_s6 = scalar_lea.vmem %s266_s26, 32  ;;  %p330_p1 = scmp.lt.s32.totalorder %s266_s26, %s266_s26 }
   0xb   :  { %p331_p2 = scmp.lt.s32.totalorder %s329_s6, %s325_s5 }
   0xd   :  { %p332_p3 = por %p331_p2, %p330_p1 }
   0xf   :  { %p333_p4 = pnand %p332_p3, %p326_p0 }
  0x14   :  { %158 = vperm.xlu1 %308, %v91_v7  }
  0x18   :  { %310 = vset.pattern.permute.xlu1 %v390_v8 }
  0x19   :  { %134 = vperm.xlu1 %310, %v91_v7  }
  0x1d   :  { %137 = vperm.xlu1 %310, %v92_v9   ;;  %161 = vperm.xlu0 %309, %v92_v9  }
  0x21   :  { %311 = vset.pattern.permute.xlu1 %v389_v5 }
  0x22   :  { %164 = vperm.xlu1 %311, %v93_v10  }
  0x26   :  { %312 = vset.pattern.permute.xlu1 %v390_v8 }
  0x27   :  { %140 = vperm.xlu1 %312, %v93_v10  }
  0x8c   :  { %v449_v11 = vpop.xlane.xlu0 %98  ;;  %v451_v12 = vpop.xlane.xlu1 %104 }
  0x8d   :  { %v106_v13 = vsub.f32 %v88_v0, %v449_v11  ;;  %v108_v14 = vsub.f32 %v426_v1, %v451_v12 }
  0x8f   :  { %v109_v15 = vmul.f32 1.442695, %v106_v13  ;;  %v113_v16 = vmul.f32 1.442695, %v108_v14 }
  0x90   :  { %v456_v17 = vpop.xlane.xlu0 %101  ;;  %v159_v19 = vpop.permute.xlu1 %158 }
  0x91   :  { %313 = vpow2.f32 %v109_v15  ;;  %v107_v18 = vsub.f32 %v431_v2, %v456_v17  ;;  %vm166_vm2 = vcmp.eq.s32.totalorder %v95_v23, %v159_v19 }
  0x92   :  { %315 = vpow2.f32 %v113_v16  ;;  %v169_v34 = vsel %vm166_vm2, %v88_v0, 0.0 }
  0x93   :  { %v111_v20 = vmul.f32 1.442695, %v107_v18  ;;  %v172_v38 = vsel %vm96_vm0, %v169_v34, 0.0 }
  0x94   :  { %v135_v21 = vpop.permute.xlu1 %134 }
  0x95   :  { %317 = vpow2.f32 %v111_v20  ;;  %vm142_vm1 = vcmp.eq.s32.totalorder %v95_v23, %v135_v21 }
  0x96   :  { %v145_v31 = vsel %vm142_vm1, %v88_v0, 0.0 }
  0x97   :  { %v148_v35 = vsel %vm96_vm0, %v145_v31, 0.0 }
  0x98   :  { %v138_v25 = vpop.permute.xlu1 %137  ;;  %v162_v28 = vpop.permute.xlu0 %161 }
  0x99   :  { %vm167_vm3 = vcmp.eq.s32.totalorder %v95_v23, %v162_v28  ;;  %vm143_vm5 = vcmp.eq.s32.totalorder %v95_v23, %v138_v25 }
  0x9a   :  { %v170_v36 = vsel %vm167_vm3, %v431_v2, 0.0  ;;  %v146_v42 = vsel %vm143_vm5, %v431_v2, 0.0 }
  0x9b   :  { %v175_v40 = vsel %vm96_vm0, %v170_v36, 0.0  ;;  %v151_v44 = vsel %vm96_vm0, %v146_v42, 0.0 }
  0x9d   :  { %v165_v32 = vpop.permute.xlu1 %164 }
  0x9e   :  { %v314_v24 = vpop.eup %313  ;;  %vm168_vm4 = vcmp.eq.s32.totalorder %v95_v23, %v165_v32 }
  0x9f   :  { %v316_v26 = vpop.eup %315  ;;  %v115_v27 = vsel %vm96_vm0, %v314_v24, 0.0  ;;  %v171_v37 = vsel %vm168_vm4, %v426_v1, 0.0 }
  0xa0   :  { %116 = vadd.xlane.f32.xlu1 %v115_v27  ;;  %v121_v29 = vsel %vm96_vm0, %v316_v26, 0.0  ;;  %v178_v41 = vsel %vm96_vm0, %v171_v37, 0.0  ;;  %v218_v37 = vld [vmem:[#allocation4] sm:$0x1] }
  0xa2   :  { %v318_v30 = vpop.eup %317  ;;  %v141_v39 = vpop.permute.xlu1 %140 }
  0xa3   :  { %v118_v33 = vsel %vm96_vm0, %v318_v30, 0.0  ;;  %vm144_vm6 = vcmp.eq.s32.totalorder %v95_v23, %v141_v39 }
  0xa4   :  { %119 = vadd.xlane.f32.xlu0 %v118_v33  ;;  %122 = vadd.xlane.f32.xlu1 %v121_v29  ;;  %v147_v43 = vsel %vm144_vm6, %v426_v1, 0.0  ;;  %v232_v33 = vld [vmem:[#allocation6] sm:$0x1] }
  0xa5   :  { %v154_v45 = vsel %vm96_vm0, %v147_v43, 0.0 }
  0xa8   :  { %173 = vadd.xlane.f32.xlu1 %v172_v38  ;;  %149 = vadd.xlane.f32.xlu0 %v148_v35  ;;  %v203_v38 = vld [vmem:[#allocation2] sm:$0x1] }
  0xac   :  { %176 = vadd.xlane.f32.xlu1 %v175_v40  ;;  %179 = vadd.xlane.f32.xlu0 %v178_v41 }
  0xb0   :  { %152 = vadd.xlane.f32.xlu1 %v151_v44 }
  0xb4   :  { %155 = vadd.xlane.f32.xlu1 %v154_v45 }
 0x129   :  { %v117_v47 = vpop.xlane.xlu1 %116 }
 0x12a   :  { %319 = vlog2.f32 %v117_v47 }
 0x12d   :  { %v120_v48 = vpop.xlane.xlu0 %119  ;;  %v123_v49 = vpop.xlane.xlu1 %122 }
 0x12e   :  { %321 = vlog2.f32 %v120_v48 }
 0x12f   :  { %323 = vlog2.f32 %v123_v49 }
 0x131   :  { %v174_v50 = vpop.xlane.xlu1 %173  ;;  %v150_v55 = vpop.xlane.xlu0 %149 }
 0x132   :  { %vm187_vm9 = vcmp.eq.f32.partialorder %v150_v55, %v449_v11 }
 0x133   :  { %v236_v1 = vsel %vm187_vm9, 1, %v390_v8 }
 0x135   :  { %v177_v52 = vpop.xlane.xlu1 %176  ;;  %v180_v10 = vpop.xlane.xlu0 %179 }
 0x137   :  { %v320_v53 = vpop.eup %319 }
 0x138   :  { %v125_v54 = vmul.f32 0.6931472, %v320_v53 }
 0x139   :  { %v153_v57 = vpop.xlane.xlu1 %152 }
 0x13a   :  { %vm188_vm8 = vcmp.eq.f32.partialorder %v153_v57, %v456_v17  ;;  %v130_v59 = vadd.f32 %v125_v54, %v449_v11 }
 0x13b   :  { %v322_v58 = vpop.eup %321  ;;  %v237_v62 = vsel %vm188_vm8, 1, %v390_v8 }
 0x13c   :  { %v324_v60 = vpop.eup %323  ;;  %v127_v61 = vmul.f32 0.6931472, %v322_v58  ;;  %v181_v3 = vsub.f32 %v130_v59, %v150_v55  ;;  %v239_v4 = vadd.s32 %v237_v62, %v236_v1  ;;  %v184_v6 = vsub.f32 %v130_v59, %v174_v50 }
 0x13d   :  { %v129_v63 = vmul.f32 0.6931472, %v324_v60  ;;  %v156_v0 = vpop.xlane.xlu1 %155 }
 0x13e   :  { %v131_v2 = vadd.f32 %v127_v61, %v456_v17  ;;  %vm189_vm11 = vcmp.eq.f32.partialorder %v156_v0, %v451_v12 }
 0x13f   :  { %v132_v5 = vadd.f32 %v129_v63, %v451_v12  ;;  %vm235_vm12 = vmand %vm189_vm11, %vm202_vm10 }
 0x140   :  { %v185_v7 = vsub.f32 %v131_v2, %v177_v52  ;;  %v182_v9 = vsub.f32 %v131_v2, %v153_v57  ;;  %v238_v11 = vsel %vm235_vm12, 1, %v390_v8 }
 0x141   :  { %v186_v13 = vsub.f32 %v132_v5, %v180_v10  ;;  %v183_v14 = vsub.f32 %v132_v5, %v156_v0  ;;  %v240_v15 = vadd.s32 %v239_v4, %v238_v11 }
 0x142   :  { %v222_v16 = vadd.f32 %v185_v7, %v184_v6  ;;  %v207_v18 = vadd.f32 %v182_v9, %v181_v3 }
 0x143   :  { %v221_v17 = vsel %vm202_vm10, %v186_v13, 0.0  ;;  %v206_v19 = vsel %vm202_vm10, %v183_v14, 0.0  ;;  %v241_v20 = vrot.slane %v240_v15, 4 }
 0x144   :  { %v223_v21 = vadd.f32 %v222_v16, %v221_v17  ;;  %v208_v12 = vadd.f32 %v207_v18, %v206_v19 }
 0x145   :  { %v242_v22 = vadd.s32 %v241_v20, %v240_v15 }
 0x146   :  { %v224_v23 = vrot.slane %v223_v21, 4  ;;  %v209_v24 = vrot.slane %v208_v12, 4 }
 0x147   :  { %v243_v25 = vrot.slane %v242_v22, 2 }
 0x148   :  { %v225_v26 = vadd.f32 %v224_v23, %v223_v21  ;;  %v210_v27 = vadd.f32 %v209_v24, %v208_v12 }
 0x149   :  { %v244_v28 = vadd.s32 %v243_v25, %v242_v22 }
 0x14a   :  { %v226_v8 = vrot.slane %v225_v26, 2  ;;  %v211_v29 = vrot.slane %v210_v27, 2 }
 0x14b   :  { %v245_v30 = vrot.slane %v244_v28, 1 }
 0x14c   :  { %v227_v31 = vadd.f32 %v226_v8, %v225_v26  ;;  %v212_v32 = vadd.f32 %v211_v29, %v210_v27 }
 0x14d   :  { %v246_v34 = vadd.s32 %v245_v30, %v244_v28 }
 0x14e   :  { %v228_v35 = vrot.slane %v227_v31, 1  ;;  %v213_v36 = vrot.slane %v212_v32, 1 }
 0x14f   :  { %v247_v39 = vadd.s32 %v246_v34, %v232_v33 }
 0x150   :  { %v229_v40 = vadd.f32 %v228_v35, %v227_v31  ;;  %v214_v41 = vadd.f32 %v213_v36, %v212_v32 }
 0x151   :  { %248 = vst.msk [vmem:[#allocation6] sm:$0x1] %vm84_vm7, %v247_v39 }
 0x152   :  { %v230_v42 = vadd.f32 %v229_v40, %v218_v37  ;;  %v215_v43 = vadd.f32 %v214_v41, %v203_v38 }
 0x154   :  { %231 = vst.msk [vmem:[#allocation4] sm:$0x1] %vm84_vm7, %v230_v42  ;;  %217 = vst.msk [vmem:[#allocation2] sm:$0x1] %vm84_vm7, %v215_v43 }
 0x155   :  { %336 = shalt.err (!%p333_p4)
}
 0x156   :  { %268 = dma.vmem_to_hbm [thread:$0]  %s266_s26, 16, %s504_s3, [#allocation5]  }
 0x157   :  { %s345_s9 = scalar_lea.vmem %s256_s28, 16  ;;  %s349_s10 = scalar_lea.vmem %s256_s28, 32 }
 0x158   :  { %p346_p5 = scmp.ne.s32.totalorder %s256_s28, %s345_s9  ;;  %p350_p6 = scmp.lt.s32.totalorder %s256_s28, %s256_s28 }
 0x159   :  { %p351_p7 = scmp.lt.s32.totalorder %s349_s10, %s345_s9 }
 0x15b   :  { %p352_p8 = por %p351_p7, %p350_p6 }
 0x15d   :  { %p353_p9 = pnand %p352_p8, %p346_p5 }
 0x15f   :  { %356 = shalt.err (!%p353_p9)
}
 0x160   :  { %258 = dma.vmem_to_hbm [thread:$0]  %s256_s28, 16, %s503_s2, [#allocation3]  }
 0x161   :  { %s365_s13 = scalar_lea.vmem %s276_s30, 16  ;;  %s369_s14 = scalar_lea.vmem %s276_s30, 32 }
 0x162   :  { %p366_p10 = scmp.ne.s32.totalorder %s276_s30, %s365_s13  ;;  %p370_p11 = scmp.lt.s32.totalorder %s276_s30, %s276_s30 }
 0x163   :  { %p371_p12 = scmp.lt.s32.totalorder %s369_s14, %s365_s13 }
 0x165   :  { %p372_p13 = por %p371_p12, %p370_p11 }
 0x167   :  { %p373_p0 = pnand %p372_p13, %p366_p10 }
 0x169   :  { %376 = shalt.err (!%p373_p0)
}
 0x16a   :  { %278 = dma.vmem_to_hbm [thread:$0]  %s276_s30, 16, %s505_s4, [#allocation5]  }
 0x16b   :  { %385 = dma.done.wait [#allocation3], 16  }
 0x16c   :  { %386 = vsyncadd [#allocation3], 4294967280 }
 0x16d   :  { %387 = dma.done.wait [#allocation5], 32  }
 0x16e   :  { %388 = vsyncadd [#allocation5], 4294967264 }
 0x16f   :  { %288 = vsyncpa [#allocation3], 1 }
 0x170   :  { %289 = vsyncpa [#allocation5], 1 }

</bundles_post_ra>
